<compile_context>
chip_gen: v6e
topology: v6e:2x2x1
jax: 0.10.0
libtpu: 0.0.40
codegen_flags: <defaults>
</compile_context>

<pallas_src>
import jax
import jax.numpy as jnp
from jax.experimental import pallas as pl
from jax.experimental.pallas import tpu as pltpu


def _round_up(x, m):
    return ((x + m - 1) // m) * m


def _make_embed_kernel(GP1, compute_dtype):
    """Fused word + ngram embedding lookup via one one-hot matmul per bucket tile.

    Refs: tok (RT, GP1) int32, msk (RT, GP1) f32 (pre-scaled: col0 = word weight,
    cols 1.. = gmask/count, all already divided by NB for CBOW), table (BKT, Dp)
    compute_dtype, y out (RT, Dp) f32 accumulator (block index constant over kb/nb).
    """

    def kernel(tok_ref, msk_ref, tab_ref, y_ref):
        kb = pl.program_id(1)   # bucket-tile reduction axis
        nb = pl.program_id(2)   # CBOW neighbor reduction axis (size 1 for SkipGram)

        @pl.when((kb == 0) & (nb == 0))
        def _init():
            y_ref[...] = jnp.zeros_like(y_ref)

        tok = tok_ref[...]                       # (RT, GP1) int32
        msk = msk_ref[...]                       # (RT, GP1) f32, pre-normalised in glue
        rt = tok.shape[0]
        bkt = tab_ref.shape[0]

        # Shift token ids into this tile's local range (cheap: (RT,GP1) tile) instead of
        # offsetting the big (RT,BKT) iota.
        rel = tok - kb * bkt
        iota = jax.lax.broadcasted_iota(jnp.int32, (rt, bkt), 1)

        # Fold word + ngram one-hots (already weighted) into ONE weight matrix.
        w = jnp.where(rel[:, 0:1] == iota, msk[:, 0:1], 0.0)
        for g in range(1, GP1):                  # GP1 is small & static
            w = w + jnp.where(rel[:, g:g + 1] == iota, msk[:, g:g + 1], 0.0)

        # Single MXU matmul per (row tile, bucket tile, neighbor); f32 accumulation.
        y_ref[...] += jnp.dot(w.astype(compute_dtype), tab_ref[...],
                              preferred_element_type=jnp.float32)

    return kernel


def _make_fc_kernel(compute_dtype):
    """fc projection, tiled over rows and vocab: out = y @ wT + b."""

    def kernel(y_ref, wT_ref, b_ref, out_ref):
        out_ref[...] = (jnp.dot(y_ref[...].astype(compute_dtype), wT_ref[...],
                                preferred_element_type=jnp.float32)
                        + b_ref[...])

    return kernel


def subword_lm_forward(words, ngrams, gmask, table, fc_w, fc_b, *,
                       batch_size, model_type="cbow", target_neighbor_size=1,
                       compute_dtype=jnp.bfloat16):
    """words:[n,S] int, ngrams:[n,S,G] int, gmask:[n,S,G] float, table:[bucket,D],
    fc_w:[V,D], fc_b:[V].  Returns CBOW:[B,1,S,V] or SG:[B,NB*T,S,V] (f32)."""
    n, S = words.shape
    G = ngrams.shape[-1]
    BK, D = table.shape
    V = fc_w.shape[0]
    B = batch_size
    NB = n // B
    GP1 = G + 1
    cbow = (model_type == "cbow")

    # ---------------- glue: fused token / pre-normalised weight tensors ----------------
    tokens = jnp.concatenate(
        [words[..., None].astype(jnp.int32), ngrams.astype(jnp.int32)], axis=-1)  # (n,S,GP1)
    gmask_f = gmask.astype(jnp.float32)
    counts = jnp.maximum(gmask_f.sum(-1, keepdims=True), 1.0)                     # (n,S,1)
    wmask = jnp.concatenate(
        [jnp.ones((n, S, 1), jnp.float32), gmask_f / counts], axis=-1)            # (n,S,GP1)
    if cbow:
        wmask = wmask * (1.0 / NB)        # fold CBOW neighbor mean into the weights

    rows = B * S if cbow else n * S
    red = NB if cbow else 1

    # ---------------- glue: tile sizes + padding to clean multiples --------------------
    RT = min(256, _round_up(rows, 8))               # row tile (parallel; keep modest for v7x)
    rows_p = _round_up(rows, RT)
    NRT = rows_p // RT

    BKT = min(512, _round_up(BK, 8))                # bucket tile (reduction)
    BKp = _round_up(BK, BKT)
    KB = BKp // BKT

    Dp = _round_up(D, 128)                          # lane-dense embed dim
    VT = min(512, _round_up(V, 128))                # vocab tile (fc output)
    Vp = _round_up(V, VT)
    NVT = Vp // VT

    if cbow:
        # neighbor-major layout so the neighbor mean becomes a grid reduction axis
        tok3 = tokens.reshape(B, NB, S, GP1).transpose(1, 0, 2, 3).reshape(NB, rows, GP1)
        msk3 = wmask.reshape(B, NB, S, GP1).transpose(1, 0, 2, 3).reshape(NB, rows, GP1)
    else:
        tok3 = tokens.reshape(1, rows, GP1)
        msk3 = wmask.reshape(1, rows, GP1)
    # padded rows get token 0 / weight 0 -> zero embedding; sliced off after the calls
    tok_flat = jnp.pad(tok3, ((0, 0), (0, rows_p - rows), (0, 0))).reshape(red * rows_p, GP1)
    msk_flat = jnp.pad(msk3, ((0, 0), (0, rows_p - rows), (0, 0))).reshape(red * rows_p, GP1)

    # bf16 (or f32) MXU operands, f32 accumulation
    table_p = jnp.pad(table.astype(jnp.float32),
                      ((0, BKp - BK), (0, Dp - D))).astype(compute_dtype)
    wT_p = jnp.pad(fc_w.T.astype(jnp.float32),
                   ((0, Dp - D), (0, Vp - V))).astype(compute_dtype)
    b_p = jnp.pad(fc_b.astype(jnp.float32), (0, Vp - V)).reshape(1, Vp)

    vmem_cap = 32 * 1024 * 1024   # explicit; safe on v5e/v6e/v7x, far above actual tile needs

    # ---------------- kernel 1: subword embedding (+ CBOW neighbor mean) ---------------
    embed_kernel = _make_embed_kernel(GP1, compute_dtype)
    y = pl.pallas_call(
        embed_kernel,
        out_shape=jax.ShapeDtypeStruct((rows_p, Dp), jnp.float32),
        grid_spec=pltpu.PrefetchScalarGridSpec(
            num_scalar_prefetch=0,
            grid=(NRT, KB, red),                      # neighbor axis innermost -> table tile
            in_specs=[                                # block index constant, no re-DMA
                pl.BlockSpec((RT, GP1), lambda i, kb, nb: (nb * NRT + i, 0)),   # tokens
                pl.BlockSpec((RT, GP1), lambda i, kb, nb: (nb * NRT + i, 0)),   # weights
                pl.BlockSpec((BKT, Dp), lambda i, kb, nb: (kb, 0)),             # table tile
            ],
            out_specs=pl.BlockSpec((RT, Dp), lambda i, kb, nb: (i, 0)),         # accumulator
        ),
        compiler_params=pltpu.CompilerParams(
            dimension_semantics=("parallel", "arbitrary", "arbitrary"),
            vmem_limit_bytes=vmem_cap),
    )(tok_flat, msk_flat, table_p)

    # ---------------- kernel 2: fc projection, tiled over vocab ------------------------
    fc_kernel = _make_fc_kernel(compute_dtype)
    logits_p = pl.pallas_call(
        fc_kernel,
        out_shape=jax.ShapeDtypeStruct((rows_p, Vp), jnp.float32),
        grid_spec=pltpu.PrefetchScalarGridSpec(
            num_scalar_prefetch=0,
            grid=(NRT, NVT),
            in_specs=[
                pl.BlockSpec((RT, Dp), lambda i, j: (i, 0)),    # y (resident across j)
                pl.BlockSpec((Dp, VT), lambda i, j: (0, j)),    # fc weight^T tile
                pl.BlockSpec((1, VT), lambda i, j: (0, j)),     # fc bias tile
            ],
            out_specs=pl.BlockSpec((RT, VT), lambda i, j: (i, j)),
        ),
        compiler_params=pltpu.CompilerParams(
            dimension_semantics=("parallel", "parallel"),
            vmem_limit_bytes=vmem_cap),
    )(y, wT_p, b_p)

    logits = logits_p[:rows, :V]
    if cbow:
        return logits.reshape(B, 1, S, V)                        # mean(1, keepdim=True)
    y4 = logits.reshape(B, NB, S, V)
    T = target_neighbor_size
    # TODO(synk): torch `.repeat(1, T, 1, 1)` materializes a T-fold HBM copy; kept only for
    #             output-shape parity — fold the repeat into the downstream loss instead.
    return jnp.broadcast_to(y4[:, None], (B, T, NB, S, V)).reshape(B, T * NB, S, V)


def reference_forward(words, ngrams, gmask, table, fc_w, fc_b, *,
                      batch_size, model_type="cbow", target_neighbor_size=1):
    n, S = words.shape
    D = table.shape[1]
    word_vec = table[words]                                       # (n, S, D)
    g_vec = table[ngrams]                                         # (n, S, G, D)
    counts = jnp.maximum(gmask.sum(-1, keepdims=True), 1.0)       # (n, S, 1)
    ngram_vec = (g_vec * gmask[..., None]).sum(2) / counts
    y = (word_vec + ngram_vec).reshape(batch_size, n // batch_size, S, D)
    if model_type == "cbow":
        y = y.mean(1, keepdims=True)
        return y @ fc_w.T + fc_b
    out = y @ fc_w.T + fc_b
    return jnp.tile(out, (1, target_neighbor_size, 1, 1))


if __name__ == "__main__":
    # Small, SubwordLM-consistent shapes.
    B, NB, S, G = 2, 3, 8, 4          # batch, neighbor_size, seq_len, max grams per word
    BUCKET, D, V = 128, 32, 64        # bucket_size, embed_dim, vocab_size
    n = B * NB

    key = jax.random.PRNGKey(0)
    k_tab, k_fcw, k_fcb, k_w, k_g, k_c = jax.random.split(key, 6)

    # Deterministic parameter init (embedding ~ N(0, 0.1); Linear ~ U(+-1/sqrt(D))).
    table = (0.1 * jax.random.normal(k_tab, (BUCKET, D))).astype(jnp.float32)
    bound = 1.0 / (D ** 0.5)
    fc_w = jax.random.uniform(k_fcw, (V, D), minval=-bound, maxval=bound).astype(jnp.float32)
    fc_b = jax.random.uniform(k_fcb, (V,), minval=-bound, maxval=bound).astype(jnp.float32)

    # Deterministic inputs: word tokens, padded ngram tokens, per-word gram counts -> mask.
    words = jax.random.randint(k_w, (n, S), 0, BUCKET, dtype=jnp.int32)
    ngrams = jax.random.randint(k_g, (n, S, G), 0, BUCKET, dtype=jnp.int32)
    gram_counts = jax.random.randint(k_c, (n, S), 1, G + 1, dtype=jnp.int32)
    gmask = (jax.lax.broadcasted_iota(jnp.int32, (n, S, G), 2)
             < gram_counts[..., None]).astype(jnp.float32)

    # ---- CBOW head ----
    ref_cbow = reference_forward(words, ngrams, gmask, table, fc_w, fc_b,
                                 batch_size=B, model_type="cbow")
    # exact f32 MXU path (tight check of kernel structure / indexing)
    out_cbow_f32 = subword_lm_forward(words, ngrams, gmask, table, fc_w, fc_b,
                                      batch_size=B, model_type="cbow",
                                      compute_dtype=jnp.float32)
    jax.block_until_ready(out_cbow_f32)
    assert out_cbow_f32.shape == (B, 1, S, V), out_cbow_f32.shape
    assert jnp.allclose(out_cbow_f32, ref_cbow, atol=1e-4, rtol=1e-4)
    # default bf16 MXU path (looser tolerance)
    out_cbow_bf16 = subword_lm_forward(words, ngrams, gmask, table, fc_w, fc_b,
                                       batch_size=B, model_type="cbow")
    jax.block_until_ready(out_cbow_bf16)
    assert jnp.allclose(out_cbow_bf16, ref_cbow, atol=2e-2, rtol=2e-2)

    # ---- SkipGram head ----
    T = 2
    ref_sg = reference_forward(words, ngrams, gmask, table, fc_w, fc_b,
                               batch_size=B, model_type="sg", target_neighbor_size=T)
    out_sg_f32 = subword_lm_forward(words, ngrams, gmask, table, fc_w, fc_b,
                                    batch_size=B, model_type="sg", target_neighbor_size=T,
                                    compute_dtype=jnp.float32)
    jax.block_until_ready(out_sg_f32)
    assert out_sg_f32.shape == (B, NB * T, S, V), out_sg_f32.shape
    assert jnp.allclose(out_sg_f32, ref_sg, atol=1e-4, rtol=1e-4)
    out_sg_bf16 = subword_lm_forward(words, ngrams, gmask, table, fc_w, fc_b,
                                     batch_size=B, model_type="sg", target_neighbor_size=T)
    jax.block_until_ready(out_sg_bf16)
    assert jnp.allclose(out_sg_bf16, ref_sg, atol=2e-2, rtol=2e-2)

    print("KERNEL_OK")
</pallas_src>

<mosaic_0001>
module attributes {stable_mosaic.version = 11 : i64} {
  func.func @kernel(%arg0: i32, %arg1: i32, %arg2: i32, %arg3: memref<16x5xi32, #tpu.memory_space<vmem>>, %arg4: memref<16x5xf32, #tpu.memory_space<vmem>>, %arg5: memref<128x128xf32, #tpu.memory_space<vmem>>, %arg6: memref<16x128xf32, #tpu.memory_space<vmem>>) attributes {dimension_semantics = [#tpu.dimension_semantics<parallel>, #tpu.dimension_semantics<arbitrary>, #tpu.dimension_semantics<arbitrary>], iteration_bounds = array<i64: 1, 1, 3>, scalar_prefetch = 0 : i64, scratch_operands = 0 : i64, tpu.core_type = #tpu.core_type<tc>, window_params = [{transform_indices = @transform_0, window_bounds = array<i64: 16, 5>}, {transform_indices = @transform_1, window_bounds = array<i64: 16, 5>}, {transform_indices = @transform_2, window_bounds = array<i64: 128, 128>}, {transform_indices = @transform_3, window_bounds = array<i64: 16, 128>}]} {
    %c0_i32 = arith.constant 0 : i32
    %0 = arith.cmpi eq, %arg1, %c0_i32 : i32
    %c0_i32_0 = arith.constant 0 : i32
    %1 = arith.cmpi eq, %arg2, %c0_i32_0 : i32
    %2 = arith.andi %0, %1 : i1
    %3 = arith.extui %2 : i1 to i32
    %c0_i32_1 = arith.constant 0 : i32
    %4 = arith.cmpi ne, %3, %c0_i32_1 : i32
    scf.if %4 {
      %cst_16 = arith.constant 0.000000e+00 : f32
      %60 = vector.broadcast %cst_16 : f32 to vector<16x128xf32>
      %c0_17 = arith.constant 0 : index
      %c0_18 = arith.constant 0 : index
      %61 = vector.load %arg6[%c0_17, %c0_18] : memref<16x128xf32, #tpu.memory_space<vmem>>, vector<16x128xf32>
      tpu.vector_store %arg6[%c0_17, %c0_18], %60 {strides = array<i32>} : memref<16x128xf32, #tpu.memory_space<vmem>>, vector<16x128xf32>,
    } else {
    }
    %c0 = arith.constant 0 : index
    %c0_2 = arith.constant 0 : index
    %5 = vector.load %arg3[%c0, %c0_2] : memref<16x5xi32, #tpu.memory_space<vmem>>, vector<16x5xi32>
    %c0_3 = arith.constant 0 : index
    %c0_4 = arith.constant 0 : index
    %6 = vector.load %arg4[%c0_3, %c0_4] : memref<16x5xf32, #tpu.memory_space<vmem>>, vector<16x5xf32>
    %c128_i32 = arith.constant 128 : i32
    %7 = arith.muli %arg1, %c128_i32 : i32
    %8 = vector.broadcast %7 : i32 to vector<16x5xi32>
    %9 = arith.subi %5, %8 : vector<16x5xi32>
    %10 = tpu.iota {dimensions = array<i32: 1>} : vector<16x128xi32>
    %11 = vector.extract_strided_slice %9 {offsets = [0, 0], sizes = [16, 1], strides = [1, 1]} : vector<16x5xi32> to vector<16x1xi32>
    %12 = vector.broadcast %11 : vector<16x1xi32> to vector<16x128xi32>
    %13 = arith.cmpi eq, %12, %10 : vector<16x128xi32>
    %14 = vector.extract_strided_slice %6 {offsets = [0, 0], sizes = [16, 1], strides = [1, 1]} : vector<16x5xf32> to vector<16x1xf32>
    %cst = arith.constant 0.000000e+00 : f32
    %15 = vector.shape_cast %14 : vector<16x1xf32> to vector<16x1xf32>
    %16 = vector.broadcast %15 : vector<16x1xf32> to vector<16x128xf32>
    %17 = vector.broadcast %cst : f32 to vector<16x128xf32>
    %18 = arith.select %13, %16, %17 : vector<16x128xi1>, vector<16x128xf32>
    %19 = vector.extract_strided_slice %9 {offsets = [0, 1], sizes = [16, 1], strides = [1, 1]} : vector<16x5xi32> to vector<16x1xi32>
    %20 = vector.broadcast %19 : vector<16x1xi32> to vector<16x128xi32>
    %21 = arith.cmpi eq, %20, %10 : vector<16x128xi32>
    %22 = vector.extract_strided_slice %6 {offsets = [0, 1], sizes = [16, 1], strides = [1, 1]} : vector<16x5xf32> to vector<16x1xf32>
    %cst_5 = arith.constant 0.000000e+00 : f32
    %23 = vector.shape_cast %22 : vector<16x1xf32> to vector<16x1xf32>
    %24 = vector.broadcast %23 : vector<16x1xf32> to vector<16x128xf32>
    %25 = vector.broadcast %cst_5 : f32 to vector<16x128xf32>
    %26 = arith.select %21, %24, %25 : vector<16x128xi1>, vector<16x128xf32>
    %27 = arith.addf %18, %26 : vector<16x128xf32>
    %28 = vector.extract_strided_slice %9 {offsets = [0, 2], sizes = [16, 1], strides = [1, 1]} : vector<16x5xi32> to vector<16x1xi32>
    %29 = vector.broadcast %28 : vector<16x1xi32> to vector<16x128xi32>
    %30 = arith.cmpi eq, %29, %10 : vector<16x128xi32>
    %31 = vector.extract_strided_slice %6 {offsets = [0, 2], sizes = [16, 1], strides = [1, 1]} : vector<16x5xf32> to vector<16x1xf32>
    %cst_6 = arith.constant 0.000000e+00 : f32
    %32 = vector.shape_cast %31 : vector<16x1xf32> to vector<16x1xf32>
    %33 = vector.broadcast %32 : vector<16x1xf32> to vector<16x128xf32>
    %34 = vector.broadcast %cst_6 : f32 to vector<16x128xf32>
    %35 = arith.select %30, %33, %34 : vector<16x128xi1>, vector<16x128xf32>
    %36 = arith.addf %27, %35 : vector<16x128xf32>
    %37 = vector.extract_strided_slice %9 {offsets = [0, 3], sizes = [16, 1], strides = [1, 1]} : vector<16x5xi32> to vector<16x1xi32>
    %38 = vector.broadcast %37 : vector<16x1xi32> to vector<16x128xi32>
    %39 = arith.cmpi eq, %38, %10 : vector<16x128xi32>
    %40 = vector.extract_strided_slice %6 {offsets = [0, 3], sizes = [16, 1], strides = [1, 1]} : vector<16x5xf32> to vector<16x1xf32>
    %cst_7 = arith.constant 0.000000e+00 : f32
    %41 = vector.shape_cast %40 : vector<16x1xf32> to vector<16x1xf32>
    %42 = vector.broadcast %41 : vector<16x1xf32> to vector<16x128xf32>
    %43 = vector.broadcast %cst_7 : f32 to vector<16x128xf32>
    %44 = arith.select %39, %42, %43 : vector<16x128xi1>, vector<16x128xf32>
    %45 = arith.addf %36, %44 : vector<16x128xf32>
    %46 = vector.extract_strided_slice %9 {offsets = [0, 4], sizes = [16, 1], strides = [1, 1]} : vector<16x5xi32> to vector<16x1xi32>
    %47 = vector.broadcast %46 : vector<16x1xi32> to vector<16x128xi32>
    %48 = arith.cmpi eq, %47, %10 : vector<16x128xi32>
    %49 = vector.extract_strided_slice %6 {offsets = [0, 4], sizes = [16, 1], strides = [1, 1]} : vector<16x5xf32> to vector<16x1xf32>
    %cst_8 = arith.constant 0.000000e+00 : f32
    %50 = vector.shape_cast %49 : vector<16x1xf32> to vector<16x1xf32>
    %51 = vector.broadcast %50 : vector<16x1xf32> to vector<16x128xf32>
    %52 = vector.broadcast %cst_8 : f32 to vector<16x128xf32>
    %53 = arith.select %48, %51, %52 : vector<16x128xi1>, vector<16x128xf32>
    %54 = arith.addf %45, %53 : vector<16x128xf32>
    %c0_9 = arith.constant 0 : index
    %c0_10 = arith.constant 0 : index
    %55 = vector.load %arg6[%c0_9, %c0_10] : memref<16x128xf32, #tpu.memory_space<vmem>>, vector<16x128xf32>
    %c0_11 = arith.constant 0 : index
    %c0_12 = arith.constant 0 : index
    %56 = vector.load %arg5[%c0_11, %c0_12] : memref<128x128xf32, #tpu.memory_space<vmem>>, vector<128x128xf32>
    %cst_13 = arith.constant dense<0.000000e+00> : vector<16x128xf32>
    %57 = tpu.matmul %54, %56, %cst_13 {dimension_numbers = #tpu.dot_dimension_numbers<[1], [0], [0], [1], [0, 0, 1, 1], [], []>} : vector<16x128xf32>, vector<128x128xf32>, vector<16x128xf32> -> vector<16x128xf32>
    %58 = arith.addf %55, %57 : vector<16x128xf32>
    %c0_14 = arith.constant 0 : index
    %c0_15 = arith.constant 0 : index
    %59 = vector.load %arg6[%c0_14, %c0_15] : memref<16x128xf32, #tpu.memory_space<vmem>>, vector<16x128xf32>
    tpu.vector_store %arg6[%c0_14, %c0_15], %58 {strides = array<i32>} : memref<16x128xf32, #tpu.memory_space<vmem>>, vector<16x128xf32>,
    return
  }
  func.func @transform_0(%arg0: i32, %arg1: i32, %arg2: i32) -> (i32, i32) {
    %c1_i32 = arith.constant 1 : i32
    %0 = arith.muli %arg2, %c1_i32 : i32
    %1 = arith.addi %0, %arg0 : i32
    %c0_i32 = arith.constant 0 : i32
    %c0_i32_0 = arith.constant 0 : i32
    return %1, %c0_i32 : i32, i32
  }
  func.func @transform_1(%arg0: i32, %arg1: i32, %arg2: i32) -> (i32, i32) {
    %c1_i32 = arith.constant 1 : i32
    %0 = arith.muli %arg2, %c1_i32 : i32
    %1 = arith.addi %0, %arg0 : i32
    %c0_i32 = arith.constant 0 : i32
    %c0_i32_0 = arith.constant 0 : i32
    return %1, %c0_i32 : i32, i32
  }
  func.func @transform_2(%arg0: i32, %arg1: i32, %arg2: i32) -> (i32, i32) {
    %c0_i32 = arith.constant 0 : i32
    %c0_i32_0 = arith.constant 0 : i32
    return %arg1, %c0_i32 : i32, i32
  }
  func.func @transform_3(%arg0: i32, %arg1: i32, %arg2: i32) -> (i32, i32) {
    %c0_i32 = arith.constant 0 : i32
    %c0_i32_0 = arith.constant 0 : i32
    return %arg0, %c0_i32 : i32, i32
  }
}

</mosaic_0001>

<bundles_post_ra>
// kernel: tpu_custom_call.1
= control target key start
LH: loop header
LB: loop body
LE: loop exit
PB: predicated region body
PF: predicated region fallthrough
CT: control target
= control target key end

     0   :  { %8 = vsyncpa [#allocation3], 0  ;;  %s895_s0 = inlined_call_operand.vmem [shape: s32[48,5], index: 0, kind: input, shape index: {}]   ;;  %s896_s1 = inlined_call_operand.vmem [shape: f32[48,5], index: 1, kind: input, shape index: {}]   ;;  %s897_s2 = inlined_call_operand.hbm [shape: f32[128,128], index: 2, kind: input, shape index: {}]   ;;  %s898_s3 = inlined_call_operand.hbm [shape: f32[16,128], index: 3, kind: output, shape index: {}]  }
   0x1   :  { %9 = vsyncpa [#allocation4], 0  ;;  %s796_s12 = smov 0   ;;  %s798_s13 = smov 0  }
   0x2   :  { %s800_s14 = smov 0  }
   0x3 LB: > { %s550_s15 = sadd.s32 4294967295, %s762_s14   ;;  %s27_s16 = sadd.s32 1, %s758_s13  ;;  %s762_s14 = sphi %s800_s14, %s15_s14   ;;  %s758_s13 = sphi %s798_s13, %s903_s13   ;;  %s754_s12 = sphi %s796_s12, %s902_s12  }
   0x4   : > { %p28_p0 = scmp.ge.s32.totalorder %s27_s16, 3  ;;  %p551_p1 = scmp.ge.s32.totalorder %s762_s14, 1 }
   0x5   : > { %p147_p2 = scmp.lt.s32.totalorder %s762_s14, 4  ;;  %p823_p4 = scmp.eq.s32.totalorder %s550_s15, 0 }
   0x6   : > { %s905_s16 = smov (%p28_p0, %s27_s16), 0  ;;  %s764_s19 = smov [#allocation2]  }
   0x7   : > { %p817_p3 = pnand %p551_p1, %p147_p2  ;;  %s162_s20 = sshll.u32 %s764_s19, 4  ;;  %s163_s20 = int_to_ptr.vmem [resolvable:$true] %s162_s20 }
   0x8   : > { %s693_s21 = scalar_lea.vmem %s163_s20, 2048  ;;  %p701_p11 = scmp.lt.s32.totalorder %s163_s20, %s163_s20 }
   0x9   : > { %p627_p5 = pneg %p817_p3  ;;  %p694_p8 = scmp.ne.s32.totalorder %s163_s20, %s693_s21 }
   0xa   : > { %p702_p12 = scmp.lt.s32.totalorder %s693_s21, %s693_s21 }
   0xb   : > { %p628_p6 = pnand %p823_p4, %p627_p5 }
   0xc   : > { %p703_p13 = por %p702_p12, %p701_p11 }
   0xd   : > { %p684_p7 = pneg %p628_p6 }
   0xf   : > { %p696_p9 = pnand %p694_p8, %p684_p7 }
  0x11   : > { %p697_p10 = pneg %p696_p9 }
  0x13   : > { %p704_p0 = pnand %p703_p13, %p697_p10 }
  0x15   : > { %707 = shalt.err (!%p704_p0)
}
  0x16   : > { %s765_s22 = smov 128   ;;  %s766_s23 = smov 8  }
  0x17   : > { %630 = dma.hbm_to_vmem [thread:$0]  (!%p628_p6), %s897_s2, 2048, %s163_s20, [#allocation3], %s765_s22, %s765_s22, %s766_s23  }
  0x18   : > { %200 = sbr.rel (%p817_p3) target bundleno = 418 (0x1a2), region = 32 }
  0x1d   : > { %745 = dma.done.wait (%p823_p4), [#allocation3], 2048  }
  0x1e   : > { %747 = vsyncadd (%p823_p4), [#allocation3], 4294965248  ;;  %s556_s26 = sshll.u32 %s754_s12, 1  ;;  %p245_p1 = scmp.eq.s32.totalorder %s754_s12, 0 }
  0x1f   : > { %p228_p2 = scmp.lt.s32.totalorder %s556_s26, 5  ;;  %v767_v0 = vmov (%p245_p1), 0.0  }
  0x20   : > { %249 = sbr.rel (!%p245_p1) target bundleno = 37 (0x25), region = 40  ;;  %250 = vst [vmem:[#allocation5] sm:$0xff] (%p245_p1), %v767_v0  ;;  %251 = vst [vmem:[#allocation5 + $0x8] sm:$0xff] (%p245_p1), %v767_v0 }
  0x21   : > { %s907_s26 = smov (!%p228_p2, %s556_s26), 5 }
  0x22   : > { %s557_s27 = sshll.u32 %s907_s26, 3 }
  0x23   : > { %s231_s30 = scalar_lea.vmem %s895_s0, %s557_s27  ;;  %s239_s6 = scalar_lea.vmem %s896_s1, %s557_s27 }
  0x25 PF: > { %v253_v1 = vld [vmem:[%s231_s30 + $0x8] sm:$0xff]  ;;  %v848_v2 = vld [vmem:[%s231_s30] sm:$0xff]  ;;  %v768_v3 = vmov 0   ;;  %v769_v5 = vmov 1   ;;  %v379_v7 = vld [vmem:[#allocation2 + $0x78] sm:$0xff]  ;;  %v770_v9 = vmov 2   ;;  %v260_v38 = vlaneseq }
  0x26   : > { %673 = vset.pattern.permute.xlu1 %v768_v3  ;;  %671 = vset.pattern.permute.xlu0 %v768_v3  ;;  %v851_v4 = vld [vmem:[%s239_s6] sm:$0xff]  ;;  %v856_v6 = vld [vmem:[%s239_s6 + $0x8] sm:$0xff]  ;;  %v378_v8 = vld [vmem:[#allocation2 + $0x70] sm:$0xff]  ;;  %v771_v12 = vmov 3   ;;  %v772_v16 = vmov 4   ;;  %s773_s7 = smov [#allocation5]  }
  0x27   : > { %266 = vperm.xlu1 %673, %v253_v1   ;;  %263 = vperm.xlu0 %671, %v848_v2   ;;  %v377_v10 = vld [vmem:[#allocation2 + $0x68] sm:$0xff]  ;;  %v376_v11 = vld [vmem:[#allocation2 + $0x60] sm:$0xff]  ;;  %v375_v13 = vld [vmem:[#allocation2 + $0x58] sm:$0xff]  ;;  %v261_v40 = vand.u32 127, %v260_v38  ;;  %s468_s8 = sshll.u32 %s773_s7, 4  ;;  %p871_p3 = scmp.eq.s32.totalorder %s550_s15, 2  ;;  %s469_s8 = int_to_ptr.vmem [resolvable:$true] %s468_s8 }
  0x28   : > { %584 = vmatprep.subr.mxu0 %v379_v7  ;;  %v374_v14 = vld [vmem:[#allocation2 + $0x50] sm:$0xff]  ;;  %v373_v15 = vld [vmem:[#allocation2 + $0x48] sm:$0xff]  ;;  %v372_v17 = vld [vmem:[#allocation2 + $0x40] sm:$0xff]  ;;  %s708_s10 = scalar_lea.vmem %s469_s8, 256  ;;  %p715_p7 = scmp.lt.s32.totalorder %s469_s8, %s469_s8 }
  0x29   : > { %585 = vmatpush3.msra.mxu0 %v379_v7  ;;  %v371_v18 = vld [vmem:[#allocation2 + $0x38] sm:$0xff]  ;;  %v370_v19 = vld [vmem:[#allocation2 + $0x30] sm:$0xff]  ;;  %v369_v20 = vld [vmem:[#allocation2 + $0x28] sm:$0xff]  ;;  %p709_p4 = scmp.ne.s32.totalorder %s469_s8, %s708_s10  ;;  %p716_p8 = scmp.lt.s32.totalorder %s708_s10, %s708_s10 }
  0x2a   : > { %586 = vmatprep.subr.mxu0 %v378_v8  ;;  %v368_v21 = vld [vmem:[#allocation2 + $0x20] sm:$0xff]  ;;  %v367_v22 = vld [vmem:[#allocation2 + $0x18] sm:$0xff]  ;;  %v366_v23 = vld [vmem:[#allocation2 + $0x10] sm:$0xff] }
  0x2b   : > { %272 = vperm.xlu1 %673, %v851_v4   ;;  %672 = vset.pattern.permute.xlu0 %v769_v5  ;;  %v365_v24 = vld [vmem:[#allocation2 + $0x8] sm:$0xff]  ;;  %v364_v25 = vld [vmem:[#allocation2] sm:$0xff]  ;;  %p710_p5 = pnand %p709_p4, %p871_p3  ;;  %p717_p9 = por %p716_p8, %p715_p7 }
  0x2c   : > { %283 = vperm.xlu0 %672, %v848_v2   ;;  %587 = vmatpush3.msra.mxu0 %v378_v8 }
  0x2d   : > { %588 = vmatprep.subr.mxu0 %v377_v10  ;;  %p711_p6 = pneg %p710_p5 }
  0x2e   : > { %589 = vmatpush3.msra.mxu0 %v377_v10 }
  0x2f   : > { %674 = vset.pattern.permute.xlu1 %v769_v5  ;;  %590 = vmatprep.subr.mxu0 %v376_v11  ;;  %p718_p10 = pnand %p717_p9, %p711_p6 }
  0x30   : > { %286 = vperm.xlu1 %674, %v253_v1   ;;  %291 = vperm.xlu0 %672, %v851_v4  }
  0x31   : > { %591 = vmatpush3.msra.mxu0 %v376_v11 }
  0x32   : > { %592 = vmatprep.subr.mxu0 %v375_v13 }
  0x33   : > { %593 = vmatpush3.msra.mxu0 %v375_v13 }
  0x34   : > { %675 = vset.pattern.permute.xlu1 %v768_v3  ;;  %295 = vperm.xlu0 %672, %v856_v6  }
  0x35   : > { %277 = vperm.xlu1 %675, %v856_v6   ;;  %594 = vmatprep.subr.mxu0 %v374_v14 }
  0x36   : > { %595 = vmatpush3.msra.mxu0 %v374_v14 }
  0x37   : > { %596 = vmatprep.subr.mxu0 %v373_v15 }
  0x38   : > { %677 = vset.pattern.permute.xlu0 %v770_v9  ;;  %597 = vmatpush3.msra.mxu0 %v373_v15 }
  0x39   : > { %676 = vset.pattern.permute.xlu1 %v770_v9  ;;  %306 = vperm.xlu0 %677, %v253_v1  }
  0x3a   : > { %303 = vperm.xlu1 %676, %v848_v2   ;;  %598 = vmatprep.subr.mxu0 %v372_v17 }
  0x3b   : > { %599 = vmatpush3.msra.mxu0 %v372_v17 }
  0x3c   : > { %600 = vmatprep.subr.mxu0 %v371_v18 }
  0x3d   : > { %678 = vset.pattern.permute.xlu0 %v771_v12  ;;  %601 = vmatpush3.msra.mxu0 %v371_v18 }
  0x3e   : > { %311 = vperm.xlu1 %676, %v851_v4   ;;  %323 = vperm.xlu0 %678, %v848_v2  }
  0x3f   : > { %602 = vmatprep.subr.mxu0 %v370_v19 }
  0x40   : > { %603 = vmatpush3.msra.mxu0 %v370_v19 }
  0x41   : > { %604 = vmatprep.subr.mxu0 %v369_v20 }
  0x42   : > { %315 = vperm.xlu1 %676, %v856_v6   ;;  %335 = vperm.xlu0 %678, %v856_v6  }
  0x43   : > { %605 = vmatpush3.msra.mxu0 %v369_v20 }
  0x44   : > { %606 = vmatprep.subr.mxu0 %v368_v21 }
  0x45   : > { %607 = vmatpush3.msra.mxu0 %v368_v21 }
  0x46   : > { %679 = vset.pattern.permute.xlu1 %v771_v12  ;;  %681 = vset.pattern.permute.xlu0 %v772_v16 }
  0x47   : > { %326 = vperm.xlu1 %679, %v253_v1   ;;  %346 = vperm.xlu0 %681, %v253_v1  }
  0x48   : > { %608 = vmatprep.subr.mxu0 %v367_v22 }
  0x49   : > { %609 = vmatpush3.msra.mxu0 %v367_v22 }
  0x4a   : > { %610 = vmatprep.subr.mxu0 %v366_v23 }
  0x4b   : > { %331 = vperm.xlu1 %679, %v851_v4   ;;  %611 = vmatpush3.msra.mxu0 %v366_v23 }
  0x4c   : > { %612 = vmatprep.subr.mxu0 %v365_v24 }
  0x4d   : > { %613 = vmatpush3.msra.mxu0 %v365_v24 }
  0x4e   : > { %614 = vmatprep.subr.mxu0 %v364_v25 }
  0x4f   : > { %680 = vset.pattern.permute.xlu1 %v772_v16  ;;  %615 = vmatpush3.msra.mxu0 %v364_v25 }
  0x50   : > { %343 = vperm.xlu1 %680, %v848_v2   ;;  %v363_v2 = vld [vmem:[#allocation5 + $0x8] sm:$0xff] }
  0x54   : > { %351 = vperm.xlu1 %680, %v851_v4   ;;  %v362_v4 = vld [vmem:[#allocation5] sm:$0xff] }
  0x58   : > { %355 = vperm.xlu1 %680, %v856_v6  }
  0xa2   : > { %v267_v26 = vpop.permute.xlu1 %266  ;;  %v264_v28 = vpop.permute.xlu0 %263 }
  0xa3   : > { %vm268_vm1 = vcmp.eq.s32.totalorder %v264_v28, %v261_v40  ;;  %vm269_vm4 = vcmp.eq.s32.totalorder %v267_v26, %v261_v40 }
  0xa6   : > { %v273_v27 = vpop.permute.xlu1 %272 }
  0xa7   : > { %v284_v30 = vpop.permute.xlu0 %283  ;;  %v280_v44 = vsel %vm268_vm1, %v273_v27, 0.0 }
  0xa8   : > { %vm288_vm0 = vcmp.eq.s32.totalorder %v284_v30, %v261_v40 }
  0xab   : > { %v287_v29 = vpop.permute.xlu1 %286  ;;  %v292_v32 = vpop.permute.xlu0 %291 }
  0xac   : > { %v298_v43 = vsel %vm288_vm0, %v292_v32, 0.0  ;;  %vm289_vm5 = vcmp.eq.s32.totalorder %v287_v29, %v261_v40 }
  0xad   : > { %v300_v47 = vadd.f32 %v298_v43, %v280_v44 }
  0xaf   : > { %v296_v35 = vpop.permute.xlu0 %295 }
  0xb0   : > { %v278_v31 = vpop.permute.xlu1 %277  ;;  %v299_v49 = vsel %vm289_vm5, %v296_v35, 0.0 }
  0xb1   : > { %v281_v50 = vsel %vm269_vm4, %v278_v31, 0.0 }
  0xb2   : > { %v301_v55 = vadd.f32 %v299_v49, %v281_v50 }
  0xb4   : > { %v307_v37 = vpop.permute.xlu0 %306 }
  0xb5   : > { %v304_v33 = vpop.permute.xlu1 %303  ;;  %vm309_vm6 = vcmp.eq.s32.totalorder %v307_v37, %v261_v40 }
  0xb6   : > { %vm308_vm2 = vcmp.eq.s32.totalorder %v304_v33, %v261_v40 }
  0xb9   : > { %v312_v34 = vpop.permute.xlu1 %311  ;;  %v324_v41 = vpop.permute.xlu0 %323 }
  0xba   : > { %vm328_vm3 = vcmp.eq.s32.totalorder %v324_v41, %v261_v40  ;;  %v318_v45 = vsel %vm308_vm2, %v312_v34, 0.0 }
  0xbb   : > { %v320_v52 = vadd.f32 %v318_v45, %v300_v47 }
  0xbd   : > { %v316_v36 = vpop.permute.xlu1 %315  ;;  %v336_v46 = vpop.permute.xlu0 %335 }
  0xbe   : > { %v319_v53 = vsel %vm309_vm6, %v316_v36, 0.0 }
  0xbf   : > { %v321_v60 = vadd.f32 %v319_v53, %v301_v55 }
  0xc2   : > { %v327_v39 = vpop.permute.xlu1 %326  ;;  %v347_v54 = vpop.permute.xlu0 %346 }
  0xc3   : > { %vm329_vm7 = vcmp.eq.s32.totalorder %v327_v39, %v261_v40  ;;  %vm349_vm9 = vcmp.eq.s32.totalorder %v347_v54, %v261_v40 }
  0xc4   : > { %v339_v58 = vsel %vm329_vm7, %v336_v46, 0.0 }
  0xc5   : > { %v341_v62 = vadd.f32 %v339_v58, %v321_v60 }
  0xc6   : > { %v332_v42 = vpop.permute.xlu1 %331 }
  0xc7   : > { %v338_v51 = vsel %vm328_vm3, %v332_v42, 0.0 }
  0xc8   : > { %v340_v56 = vadd.f32 %v338_v51, %v320_v52 }
  0xcb   : > { %v344_v48 = vpop.permute.xlu1 %343 }
  0xcc   : > { %vm348_vm8 = vcmp.eq.s32.totalorder %v344_v48, %v261_v40 }
  0xcf   : > { %v352_v57 = vpop.permute.xlu1 %351 }
  0xd0   : > { %v358_v59 = vsel %vm348_vm8, %v352_v57, 0.0 }
  0xd1   : > { %v360_v61 = vadd.f32 %v358_v59, %v340_v56 }
  0xd3   : > { %v356_v63 = vpop.permute.xlu1 %355  ;;  %616 = vmatprep.mubr.f32.mxu0 %v360_v61 }
  0xd4   : > { %v359_v0 = vsel %vm349_vm9, %v356_v63, 0.0 }
  0xd5   : > { %v361_v1 = vadd.f32 %v359_v0, %v341_v62 }
  0xd7   : > { %617 = vmatmul.mubr.f32.vlgmr.msra.gmra.mxu0 %v361_v1 }
 0x197   : > { %v618_v3 = vpop.f32.mrf.mxu0 }
 0x198   : > { %v456_v5 = vadd.f32 %v618_v3, %v363_v2 }
 0x199   : > { %v446_v6 = vpop.f32.mrf.mxu0 }
 0x19a   : > { %458 = vst [vmem:[#allocation5 + $0x8] sm:$0xff] %v456_v5  ;;  %v455_v7 = vadd.f32 %v446_v6, %v362_v4 }
 0x19c   : > { %457 = vst [vmem:[#allocation5] sm:$0xff] %v455_v7 }
 0x19d   : > { %721 = shalt.err (!%p718_p10)
}
 0x19e   : > { %s774_s11 = smov 128   ;;  %s775_s12 = smov 8  }
 0x19f   : > { %624 = dma.vmem_to_hbm [thread:$0]  (%p871_p3), %s469_s8, 256, %s898_s3, [#allocation4], %s774_s11, %s774_s11, %s775_s12  }
 0x1a0   : > { %749 = dma.done.wait (%p871_p3), [#allocation4], 256  }
 0x1a1   : > { %751 = vsyncadd (%p871_p3), [#allocation4], 4294967040 }
 0x1a2 PF: > { %s15_s14 = sadd.s32 1, %s762_s14   ;;  %s902_s12 = smov %s758_s13 }
 0x1a3   : > { %p12_p11 = scmp.ge.s32.totalorder %s15_s14, 5   ;;  %s903_s13 = smov %s905_s16 }
 0x1a5   :  { %14 = sbr.rel (!%p12_p11) target bundleno = 3 (0x3), region = 73 }
 0x1aa   :  { %484 = vsyncpa [#allocation3], 1 }
 0x1ab   :  { %486 = vsyncpa [#allocation3 + $0x1], 1 }
 0x1ac   :  { %487 = vsyncpa [#allocation4], 1 }
 0x1ad   :  { %489 = vsyncpa [#allocation4 + $0x1], 1 }

</bundles_post_ra>
